<compile_context>
chip_gen: v7x
topology: tpu7x:2x2x1
jax: 0.10.0
libtpu: 0.0.40
codegen_flags: <defaults>
</compile_context>

<pallas_src>
import functools

import jax
import jax.numpy as jnp
from jax import lax
from jax.experimental import pallas as pl
from jax.experimental.pallas import tpu as pltpu


# ---------------------------------------------------------------------------
# Tiling helpers
# ---------------------------------------------------------------------------

_LANE = 128


def _pick_tile(n: int, multiple_of: int, cap: int) -> int:
    """Largest divisor of n that is a multiple of `multiple_of` and <= cap.

    Falls back to the smallest such divisor (if all exceed cap), then to n
    itself (full extent) if no divisor is a multiple of `multiple_of`.  The
    result is therefore always either a multiple of `multiple_of` or == n,
    which satisfies the TPU (8,128)-or-full-extent block constraint.
    """
    cands = [d for d in range(1, n + 1) if n % d == 0 and d % multiple_of == 0]
    if not cands:
        return n
    leq = [d for d in cands if d <= cap]
    return max(leq) if leq else min(cands)


def _sublane_multiple(dtype) -> int:
    # f32 -> 8, bf16/f16 -> 16, int8/fp8 -> 32 (packed-dtype sublane tiling)
    return {4: 8, 2: 16, 1: 32}.get(jnp.dtype(dtype).itemsize, 8)


def _vmem_budgets():
    """(vmem_limit_bytes, per-input-block budget) for the current generation."""
    try:
        cap = int(pltpu.get_tpu_info().vmem_capacity_bytes)
    except Exception:
        cap = 64 * 1024 * 1024                       # conservative fallback
    if cap <= 64 * 1024 * 1024:                      # v7x-class: 64 MiB VMEM
        return 48 * 1024 * 1024, 8 * 1024 * 1024
    return 64 * 1024 * 1024, 12 * 1024 * 1024        # v5e / v6e: 128 MiB VMEM


def _reduce_tiles(B, S, H, dtype, budget):
    """Pick (tb, ts, th) and grid extents for the mean/max reduction."""
    itemsize = jnp.dtype(dtype).itemsize
    sub = _sublane_multiple(dtype)
    tb_min = B if B < 8 else 8
    b_splittable = (B % 8 == 0) and (B >= 16)        # can give >= 2 B tiles

    # H tile: full H whenever a minimal (tb_min, sub, H) block fits the budget
    # (contiguous per-row DMA runs, lane-dense stores, no H grid axis).
    if tb_min * sub * H * itemsize <= budget:
        th = H
    else:
        th = _pick_tile(H, _LANE, max(_LANE, budget // (tb_min * sub * itemsize)))
    # Guarantee >= 2 parallel (b, h) tiles for dual-TensorCore chips (v7x).
    if (not b_splittable) and th == H and H % 2 == 0 and (H // 2) % _LANE == 0:
        th = H // 2
    nh = H // th

    # S tile: as large as the budget allows at the minimal B tile.
    ts = _pick_tile(S, sub, max(sub, budget // max(1, tb_min * th * itemsize)))
    ns = S // ts

    # B tile: fill the remaining budget; keep >= 2 B tiles when possible.
    cap_tb = max(tb_min, budget // max(1, ts * th * itemsize))
    if b_splittable:
        cap_tb = min(cap_tb, B // 2)
    tb = _pick_tile(B, 8, min(cap_tb, B))
    nb = B // tb

    return tb, ts, th, nb, ns, nh


# ---------------------------------------------------------------------------
# Kernels
# ---------------------------------------------------------------------------

def _make_reduce_kernel(pool_type: str, seq_len: int, acc_init):
    """mean / max over the S axis (grid axis 2) with a VMEM accumulator."""
    inv_s = float(1.0 / seq_len)

    def kernel(x_ref, o_ref, acc_ref):
        s = pl.program_id(2)

        @pl.when(s == 0)
        def _init():
            acc_ref[...] = jnp.full_like(acc_ref, acc_init)

        if pool_type == "mean":
            # Accumulate in f32 without materialising an f32 copy of the block.
            acc_ref[...] += jnp.sum(x_ref[...], axis=1, dtype=jnp.float32)
        else:  # max: exact in the input dtype, no cast work.
            acc_ref[...] = jnp.maximum(acc_ref[...], jnp.max(x_ref[...], axis=1))

        @pl.when(s == pl.num_programs(2) - 1)
        def _finalize():
            acc = acc_ref[...]
            if pool_type == "mean":
                acc = acc * inv_s
            o_ref[...] = acc.astype(o_ref.dtype)

    return kernel


def _copy_kernel(s_ref, o_ref):
    """last_bi (aligned): the index_map already picked the correct slab."""
    o_ref[...] = s_ref[...]


def _make_select_kernel(half: int):
    """last_bi (unaligned fallback): out[:, h] = last if h < half else first."""

    def kernel(s_ref, o_ref):
        lane = lax.broadcasted_iota(jnp.int32, o_ref.shape, 1)
        o_ref[...] = jnp.where(lane < half, s_ref[0], s_ref[1])

    return kernel


# ---------------------------------------------------------------------------
# Wrapper
# ---------------------------------------------------------------------------

@functools.partial(jax.jit, static_argnames=("pool_type",))
def seq_pool(x: jax.Array, pool_type: str) -> jax.Array:
    """Pallas implementation of SeqPool.forward:  (B, S, H) -> (B, H)."""
    pool_type = pool_type.lower()
    if pool_type not in ("mean", "max", "last", "first", "last_bi"):
        raise ValueError(f"unknown pool_type: {pool_type}")

    B, S, H = x.shape
    dtype = x.dtype
    itemsize = jnp.dtype(dtype).itemsize
    vmem_limit, budget = _vmem_budgets()

    # ---------------- mean / max : streaming reduction over S ----------------
    if pool_type in ("mean", "max"):
        tb, ts, th, nb, ns, nh = _reduce_tiles(B, S, H, dtype, budget)

        if pool_type == "mean":
            acc_dtype = jnp.float32
            acc_init = 0.0
        else:
            acc_dtype = dtype
            acc_init = (float("-inf") if jnp.issubdtype(dtype, jnp.floating)
                        else int(jnp.iinfo(dtype).min))

        kernel = _make_reduce_kernel(pool_type, S, acc_init)
        return pl.pallas_call(
            kernel,
            out_shape=jax.ShapeDtypeStruct((B, H), dtype),
            grid=(nb, nh, ns),
            in_specs=[pl.BlockSpec((tb, ts, th), lambda b, h, s: (b, s, h))],
            out_specs=pl.BlockSpec((tb, th), lambda b, h, s: (b, h)),
            scratch_shapes=[pltpu.VMEM((tb, th), acc_dtype)],
            compiler_params=pltpu.CompilerParams(
                dimension_semantics=("parallel", "parallel", "arbitrary"),
                vmem_limit_bytes=vmem_limit,
            ),
            cost_estimate=pl.CostEstimate(
                flops=B * S * H,
                transcendentals=0,
                bytes_accessed=B * S * H * itemsize + B * H * itemsize,
            ),
        )(x)

    # ---------------- first / last : pure data movement ----------------------
    # Per perf review: a Pallas copy pass here would only add a redundant full
    # HBM round trip (slice copy + kernel read + kernel write), so return the
    # slice directly -- semantics identical to x[:, 0/-1, :].
    if pool_type == "last":
        return x[:, S - 1, :]
    if pool_type == "first":
        return x[:, 0, :]

    # ---------------- last_bi : cat(last[:, :H//2], first[:, H//2:]) ---------
    half = H // 2
    stacked = jnp.stack([x[:, S - 1, :], x[:, 0, :]], axis=0)   # (2, B, H)
    tb = _pick_tile(B, 8, 256)
    nb = B // tb
    cparams = pltpu.CompilerParams(
        dimension_semantics=("parallel", "parallel"),
        vmem_limit_bytes=vmem_limit,
    )
    out_shape = jax.ShapeDtypeStruct((B, H), dtype)

    if half > 0 and H % 2 == 0 and half % _LANE == 0:
        # Each H tile lies entirely in the 'last' or the 'first' half, so the
        # index_map selects the single slab that tile needs (only that slab is
        # DMA'd) and the kernel is a pure copy -- no per-element select work.
        th = _pick_tile(half, _LANE, 1024)
        nh = H // th
        return pl.pallas_call(
            _copy_kernel,
            out_shape=out_shape,
            grid=(nb, nh),
            in_specs=[pl.BlockSpec((None, tb, th),
                                   lambda b, h: ((h * th) // half, b, h))],
            out_specs=pl.BlockSpec((tb, th), lambda b, h: (b, h)),
            compiler_params=cparams,
        )(stacked)

    # Fallback (H//2 not lane-aligned, e.g. small or odd H): one full-H tile,
    # half/half select in-kernel.
    return pl.pallas_call(
        _make_select_kernel(half),
        out_shape=out_shape,
        grid=(nb, 1),
        in_specs=[pl.BlockSpec((2, tb, H), lambda b, h: (0, b, h))],
        out_specs=pl.BlockSpec((tb, H), lambda b, h: (b, h)),
        compiler_params=cparams,
    )(stacked)


# ---------------------------------------------------------------------------
# Reference + test
# ---------------------------------------------------------------------------

def _reference(x, pool_type):
    pool_type = pool_type.lower()
    if pool_type == "mean":
        return jnp.mean(x.astype(jnp.float32), axis=1).astype(x.dtype)
    if pool_type == "max":
        return jnp.max(x, axis=1)
    if pool_type == "last":
        return x[:, -1, :]
    if pool_type == "first":
        return x[:, 0, :]
    if pool_type == "last_bi":
        dim = x.shape[2]
        return jnp.concatenate([x[:, -1, : dim // 2], x[:, 0, dim // 2:]], axis=-1)
    raise ValueError(pool_type)


if __name__ == "__main__":
    key = jax.random.PRNGKey(0)
    ok = True

    cases = [
        ((2, 8, 32), jnp.float32),       # small shape matching the module's toy usage
        ((2, 8, 32), jnp.bfloat16),      # packed dtype: sublane=16 tiles, f32 accumulate
        ((8, 512, 1024), jnp.float32),   # big-block path + H split for parallel tiles
    ]
    for (B, S, H), dt in cases:
        key, sub = jax.random.split(key)
        x = jax.random.normal(sub, (B, S, H), dtype=jnp.float32).astype(dt)
        tol = 2e-5 if dt == jnp.float32 else 2e-2
        for pt in ("mean", "max", "last", "first", "last_bi"):
            out = jax.block_until_ready(seq_pool(x, pt))
            ref = _reference(x, pt)
            good = out.shape == ref.shape and bool(
                jnp.allclose(out.astype(jnp.float32), ref.astype(jnp.float32),
                             atol=tol, rtol=tol))
            if not good:
                ok = False
                print(f"MISMATCH pool_type={pt} shape={(B, S, H)} dtype={dt}")

    if ok:
        print("KERNEL_OK")
</pallas_src>

<mosaic_0001>
module attributes {stable_mosaic.version = 11 : i64} {
  func.func @kernel(%arg0: i32, %arg1: i32, %arg2: i32, %arg3: memref<2x8x32xf32, #tpu.memory_space<vmem>>, %arg4: memref<2x32xf32, #tpu.memory_space<vmem>>, %arg5: memref<2x32xf32, #tpu.memory_space<vmem>>) attributes {dimension_semantics = [#tpu.dimension_semantics<parallel>, #tpu.dimension_semantics<parallel>, #tpu.dimension_semantics<arbitrary>], iteration_bounds = array<i64: 1, 1, 1>, scalar_prefetch = 0 : i64, scratch_operands = 1 : i64, tpu.core_type = #tpu.core_type<tc>, window_params = [{transform_indices = @transform_0, window_bounds = array<i64: 2, 8, 32>}, {transform_indices = @transform_1, window_bounds = array<i64: 2, 32>}]} {
    %c0_i32 = arith.constant 0 : i32
    %0 = arith.cmpi eq, %arg2, %c0_i32 : i32
    %1 = arith.extui %0 : i1 to i32
    %c0_i32_0 = arith.constant 0 : i32
    %2 = arith.cmpi ne, %1, %c0_i32_0 : i32
    scf.if %2 {
      %cst_9 = arith.constant 0.000000e+00 : f32
      %11 = vector.broadcast %cst_9 : f32 to vector<2x32xf32>
      %c0_10 = arith.constant 0 : index
      %c0_11 = arith.constant 0 : index
      %12 = vector.load %arg5[%c0_10, %c0_11] : memref<2x32xf32, #tpu.memory_space<vmem>>, vector<2x32xf32>
      tpu.vector_store %arg5[%c0_10, %c0_11], %11 {strides = array<i32>} : memref<2x32xf32, #tpu.memory_space<vmem>>, vector<2x32xf32>,
    } else {
    }
    %c0 = arith.constant 0 : index
    %c0_1 = arith.constant 0 : index
    %3 = vector.load %arg5[%c0, %c0_1] : memref<2x32xf32, #tpu.memory_space<vmem>>, vector<2x32xf32>
    %c0_2 = arith.constant 0 : index
    %c0_3 = arith.constant 0 : index
    %c0_4 = arith.constant 0 : index
    %4 = vector.load %arg3[%c0_2, %c0_3, %c0_4] : memref<2x8x32xf32, #tpu.memory_space<vmem>>, vector<2x8x32xf32>
    %cst = arith.constant dense<0.000000e+00> : vector<2x32xf32>
    %5 = vector.multi_reduction <add>, %4, %cst [1] : vector<2x8x32xf32> to vector<2x32xf32>
    %6 = arith.addf %3, %5 : vector<2x32xf32>
    %c0_5 = arith.constant 0 : index
    %c0_6 = arith.constant 0 : index
    %7 = vector.load %arg5[%c0_5, %c0_6] : memref<2x32xf32, #tpu.memory_space<vmem>>, vector<2x32xf32>
    tpu.vector_store %arg5[%c0_5, %c0_6], %6 {strides = array<i32>} : memref<2x32xf32, #tpu.memory_space<vmem>>, vector<2x32xf32>,
    %c0_i32_7 = arith.constant 0 : i32
    %8 = arith.cmpi eq, %arg2, %c0_i32_7 : i32
    %9 = arith.extui %8 : i1 to i32
    %c0_i32_8 = arith.constant 0 : i32
    %10 = arith.cmpi ne, %9, %c0_i32_8 : i32
    scf.if %10 {
      %c0_9 = arith.constant 0 : index
      %c0_10 = arith.constant 0 : index
      %11 = vector.load %arg5[%c0_9, %c0_10] : memref<2x32xf32, #tpu.memory_space<vmem>>, vector<2x32xf32>
      %cst_11 = arith.constant 1.250000e-01 : f32
      %12 = vector.broadcast %cst_11 : f32 to vector<2x32xf32>
      %13 = arith.mulf %11, %12 : vector<2x32xf32>
      %c0_12 = arith.constant 0 : index
      %c0_13 = arith.constant 0 : index
      %14 = vector.load %arg4[%c0_12, %c0_13] : memref<2x32xf32, #tpu.memory_space<vmem>>, vector<2x32xf32>
      tpu.vector_store %arg4[%c0_12, %c0_13], %13 {strides = array<i32>} : memref<2x32xf32, #tpu.memory_space<vmem>>, vector<2x32xf32>,
    } else {
    }
    return
  }
  func.func @transform_0(%arg0: i32, %arg1: i32, %arg2: i32) -> (i32, i32, i32) {
    %c0_i32 = arith.constant 0 : i32
    return %arg0, %arg2, %arg1 : i32, i32, i32
  }
  func.func @transform_1(%arg0: i32, %arg1: i32, %arg2: i32) -> (i32, i32) {
    %c0_i32 = arith.constant 0 : i32
    return %arg0, %arg1 : i32, i32
  }
}

</mosaic_0001>

<bundles_post_ra>
// kernel: seq_pool.1
= control target key start
LH: loop header
LB: loop body
LE: loop exit
PB: predicated region body
PF: predicated region fallthrough
CT: control target
= control target key end

     0   :  { %6 = vsyncpa [#allocation4], 0  ;;  %s171_s0 = inlined_call_operand.hbm [shape: f32[2,8,32], index: 0, kind: input, shape index: {}]   ;;  %s172_s1 = inlined_call_operand.hbm [shape: f32[2,32], index: 1, kind: output, shape index: {}]  }
   0x1   :  { %7 = vsyncpa [#allocation5], 0  ;;  %s129_s6 = smov [#allocation3]   ;;  %s81_s10 = scalar_lea.hbm %s171_s0, 256 }
   0x2   :  { %s13_s7 = sshll.u32 %s129_s6, 4  ;;  %p82_p0 = scmp.ne.s32.totalorder %s171_s0, %s81_s10  ;;  %s14_s7 = int_to_ptr.vmem [resolvable:$true] %s13_s7 }
   0x3   :  { %p85_p1 = scmp.lt.u32.totalorder %s81_s10, %s171_s0 }
   0x5   :  { %p87_p2 = pnand %p85_p1, %p82_p0 }
   0x7   :  { %90 = shalt.err (!%p87_p2)
}
   0x8   :  { %s91_s15 = scalar_lea.vmem %s14_s7, 256  ;;  %p96_p4 = scmp.lt.s32.totalorder %s14_s7, %s14_s7 }
   0x9   :  { %p92_p3 = scmp.ne.s32.totalorder %s14_s7, %s91_s15  ;;  %p97_p5 = scmp.lt.s32.totalorder %s91_s15, %s91_s15 }
   0xb   :  { %p98_p6 = por %p97_p5, %p96_p4 }
   0xd   :  { %p99_p7 = pnand %p98_p6, %p92_p3 }
   0xf   :  { %102 = shalt.err (!%p99_p7)
}
  0x10   :  { %s130_s16 = smov 128   ;;  %s131_s17 = smov 8  }
  0x11   :  { %19 = dma.hbm_to_vmem [thread:$0]  %s171_s0, 256, %s14_s7, [#allocation4], %s130_s16, %s130_s16, %s131_s17  }
  0x12   :  { %125 = dma.done.wait [#allocation4], 256  }
  0x13   :  { %126 = vsyncadd [#allocation4], 4294967040  ;;  %vm27_vm0 = vcmask 254976   ;;  %v132_v0 = vmov 0.0   ;;  %vm32_vm1 = vcmask 261120   ;;  %v30_v1 = vld [vmem:[#allocation3] sm:$0xff] }
  0x14   :  { %28 = vst.msk [vmem:[#allocation2] sm:$0x3] %vm27_vm0, %v132_v0  ;;  %v31_v2 = vld [vmem:[#allocation3 + $0x8] sm:$0xff]  ;;  %v33_v3 = vsel %vm32_vm1, %v30_v1, 0.0  ;;  %vm49_vm2 = vcmask 1041409   ;;  %s133_s0 = smov [#allocation6]  }
  0x15   :  { %v40_v4 = vsel %vm32_vm1, %v31_v2, 0.0  ;;  %v34_v5 = vrot.slane %v33_v3, 4  ;;  %s67_s20 = sshll.u32 %s133_s0, 4  ;;  %s68_s20 = int_to_ptr.vmem [resolvable:$true] %s67_s20 }
  0x16   :  { %v41_v6 = vrot.slane %v40_v4, 4  ;;  %s103_s21 = scalar_lea.vmem %s68_s20, 32  ;;  %p108_p9 = scmp.lt.s32.totalorder %s68_s20, %s68_s20 }
  0x17   :  { %v35_v7 = vadd.f32 %v34_v5, %v33_v3  ;;  %p104_p8 = scmp.ne.s32.totalorder %s68_s20, %s103_s21  ;;  %p109_p10 = scmp.lt.s32.totalorder %s103_s21, %s103_s21 }
  0x18   :  { %v42_v8 = vadd.f32 %v41_v6, %v40_v4 }
  0x19   :  { %v36_v9 = vrot.slane %v35_v7, 2  ;;  %p110_p11 = por %p109_p10, %p108_p9 }
  0x1a   :  { %v43_v10 = vrot.slane %v42_v8, 2 }
  0x1b   :  { %v37_v11 = vadd.f32 %v36_v9, %v35_v7  ;;  %v29_v15 = vld [vmem:[#allocation2] sm:$0x3]  ;;  %p111_p12 = pnand %p110_p11, %p104_p8 }
  0x1c   :  { %v44_v12 = vadd.f32 %v43_v10, %v42_v8 }
  0x1d   :  { %v38_v13 = vrot.slane %v37_v11, 1 }
  0x1e   :  { %v45_v14 = vrot.slane %v44_v12, 1 }
  0x1f   :  { %v39_v16 = vadd.f32 %v38_v13, %v37_v11 }
  0x20   :  { %v46_v17 = vadd.f32 %v45_v14, %v44_v12 }
  0x22   :  { %v50_v18 = vsel %vm49_vm2, %v46_v17, %v39_v16 }
  0x23   :  { %v52_v19 = vadd.f32 %v50_v18, %v29_v15 }
  0x25   :  { %54 = vst.msk [vmem:[#allocation2] sm:$0x3] %vm27_vm0, %v52_v19 }
  0x2c   :  { %v58_v20 = vld [vmem:[#allocation2] sm:$0x3] }
  0x2d   :  { %v59_v21 = vmul.f32 0.125, %v58_v20 }
  0x2f   :  { %60 = vst.msk [vmem:[#allocation6] sm:$0x3] %vm27_vm0, %v59_v21 }
  0x30   :  { %114 = shalt.err (!%p111_p12)
}
  0x31   :  { %s115_s24 = scalar_lea.hbm %s172_s1, 32 }
  0x32   :  { %p116_p13 = scmp.ne.s32.totalorder %s172_s1, %s115_s24  ;;  %p119_p0 = scmp.lt.u32.totalorder %s115_s24, %s172_s1 }
  0x34   :  { %p121_p1 = pnand %p119_p0, %p116_p13 }
  0x36   :  { %124 = shalt.err (!%p121_p1)
}
  0x37   :  { %70 = dma.vmem_to_hbm [thread:$0]  %s68_s20, 32, %s172_s1, [#allocation5]  }
  0x38   :  { %127 = dma.done.wait [#allocation5], 32  }
  0x39   :  { %128 = vsyncadd [#allocation5], 4294967264 }
  0x3a   :  { %74 = vsyncpa [#allocation4], 1 }
  0x3b   :  { %75 = vsyncpa [#allocation5], 1 }

</bundles_post_ra>
